<compile_context>
chip_gen: v6e
topology: v6e:2x2x1
jax: 0.10.0
libtpu: 0.0.40
codegen_flags: <defaults>
</compile_context>

<pallas_src>
import jax
import jax.numpy as jnp
from jax.experimental import pallas as pl
from jax.experimental.pallas import tpu as pltpu


# ---------------------------------------------------------------------------
# Model hyper-parameters (small, consistent with the module's __init__)
# ---------------------------------------------------------------------------
FACTOR_NUM = 16
LAYERS = [2 * FACTOR_NUM, 64, 32, 16]   # layers[0] must be 2*factor_num
NUM_USERS = 50
NUM_ITEMS = 60
BATCH = 8

_VOCAB_PAD = 128  # pad embedding vocab dims to a lane-friendly multiple


# ---------------------------------------------------------------------------
# Pallas kernel: fused gather + MLP (transposed, lane-dense activations)
# ---------------------------------------------------------------------------
def _mlp_kernel(uidx_ref, iidx_ref,
                emb_u_ref, emb_i_ref,
                w1u_ref, w1i_ref, b1_ref,
                w2_ref, b2_ref,
                w3_ref, b3_ref,
                wo_ref, bo_ref,
                o_ref):
    tb = o_ref.shape[1]                                   # batch tile (lanes)

    # --- fused embedding gather: one-hot matmul on the MXU -----------------
    uid = uidx_ref[...]                                   # (1, tb) int32
    iid = iidx_ref[...]                                   # (1, tb) int32
    vu = emb_u_ref.shape[1]
    vi = emb_i_ref.shape[1]
    onehot_u = (jax.lax.broadcasted_iota(jnp.int32, (vu, tb), 0)
                == uid).astype(jnp.float32)               # (Vu_pad, tb)
    onehot_i = (jax.lax.broadcasted_iota(jnp.int32, (vi, tb), 0)
                == iid).astype(jnp.float32)               # (Vi_pad, tb)
    u = jnp.dot(emb_u_ref[...], onehot_u,
                preferred_element_type=jnp.float32)       # (F, tb)
    it = jnp.dot(emb_i_ref[...], onehot_i,
                 preferred_element_type=jnp.float32)      # (F, tb)

    # --- fc layer 1: split W1 (user/item halves) => no concat, + ReLU ------
    v = (jnp.dot(w1u_ref[...], u, preferred_element_type=jnp.float32)
         + jnp.dot(w1i_ref[...], it, preferred_element_type=jnp.float32)
         + b1_ref[...])
    v = jnp.maximum(v, 0.0)                               # (64, tb)

    # --- fc layers 2, 3 + ReLU ---------------------------------------------
    v = jnp.maximum(
        jnp.dot(w2_ref[...], v, preferred_element_type=jnp.float32)
        + b2_ref[...], 0.0)                               # (32, tb)
    v = jnp.maximum(
        jnp.dot(w3_ref[...], v, preferred_element_type=jnp.float32)
        + b3_ref[...], 0.0)                               # (16, tb)

    # --- affine_output + sigmoid, lane-dense (1, tb) store ------------------
    logits = jnp.dot(wo_ref[...], v,
                     preferred_element_type=jnp.float32) + bo_ref[...]
    o_ref[...] = jax.nn.sigmoid(logits).astype(o_ref.dtype)


# ---------------------------------------------------------------------------
# Parameter construction (deterministic, PyTorch-style layout)
# ---------------------------------------------------------------------------
def init_params(key):
    keys = jax.random.split(key, 12)

    def linear(kw, kb, fan_in, fan_out):
        # PyTorch-style uniform(-1/sqrt(fan_in), 1/sqrt(fan_in))
        bound = 1.0 / jnp.sqrt(jnp.float32(fan_in))
        w = jax.random.uniform(kw, (fan_in, fan_out), jnp.float32, -bound, bound)
        b = jax.random.uniform(kb, (1, fan_out), jnp.float32, -bound, bound)
        return w, b

    params = {}
    # nn.Embedding default init: N(0, 1)
    params["emb_user"] = jax.random.normal(keys[0], (NUM_USERS, FACTOR_NUM), jnp.float32)
    params["emb_item"] = jax.random.normal(keys[1], (NUM_ITEMS, FACTOR_NUM), jnp.float32)

    params["w1"], params["b1"] = linear(keys[2], keys[3], LAYERS[0], LAYERS[1])
    params["w2"], params["b2"] = linear(keys[4], keys[5], LAYERS[1], LAYERS[2])
    params["w3"], params["b3"] = linear(keys[6], keys[7], LAYERS[2], LAYERS[3])
    params["wo"], params["bo"] = linear(keys[8], keys[9], LAYERS[3], 1)
    return params


def prepare_kernel_params(params):
    """One-time conversion to the kernel's transposed / padded layout."""
    def pad_cols(x, mult=_VOCAB_PAD):
        pad = (-x.shape[1]) % mult
        return jnp.pad(x, ((0, 0), (0, pad))) if pad else x

    F = FACTOR_NUM
    kp = {}
    kp["emb_u_t"] = pad_cols(params["emb_user"].T)        # (F, Vu_pad)
    kp["emb_i_t"] = pad_cols(params["emb_item"].T)        # (F, Vi_pad)
    kp["w1u_t"] = params["w1"][:F, :].T                   # (64, F)
    kp["w1i_t"] = params["w1"][F:, :].T                   # (64, F)
    kp["b1"] = params["b1"].T                             # (64, 1)
    kp["w2_t"] = params["w2"].T                           # (32, 64)
    kp["b2"] = params["b2"].T                             # (32, 1)
    kp["w3_t"] = params["w3"].T                           # (16, 32)
    kp["b3"] = params["b3"].T                             # (16, 1)
    kp["wo_t"] = params["wo"].T                           # (1, 16)
    kp["bo"] = params["bo"].T                             # (1, 1)
    return jax.tree_util.tree_map(jnp.asarray, kp)


# ---------------------------------------------------------------------------
# Forward: everything (gather, concat-equivalent, MLP, sigmoid) in one kernel
# ---------------------------------------------------------------------------
def forward(user_indices, item_indices, kp, *, tile_b=None):
    B = user_indices.shape[0]
    if tile_b is None:
        # >= 2 grid steps at realistic batch sizes (v7x dual-TC + pipelining);
        # at tiny batch just take the whole thing in one step.
        tile_b = B if B <= 256 else 256
    assert B % tile_b == 0, "batch must be a multiple of tile_b"

    uidx = user_indices.reshape(1, B).astype(jnp.int32)
    iidx = item_indices.reshape(1, B).astype(jnp.int32)

    full = lambda a: pl.BlockSpec(a.shape, lambda i: (0, 0))

    out = pl.pallas_call(
        _mlp_kernel,
        out_shape=jax.ShapeDtypeStruct((1, B), jnp.float32),
        grid=(B // tile_b,),
        in_specs=[
            pl.BlockSpec((1, tile_b), lambda i: (0, i)),   # user indices
            pl.BlockSpec((1, tile_b), lambda i: (0, i)),   # item indices
            full(kp["emb_u_t"]), full(kp["emb_i_t"]),
            full(kp["w1u_t"]), full(kp["w1i_t"]), full(kp["b1"]),
            full(kp["w2_t"]), full(kp["b2"]),
            full(kp["w3_t"]), full(kp["b3"]),
            full(kp["wo_t"]), full(kp["bo"]),
        ],
        out_specs=pl.BlockSpec((1, tile_b), lambda i: (0, i)),
        compiler_params=pltpu.CompilerParams(
            dimension_semantics=("parallel",)),
    )(uidx, iidx,
      kp["emb_u_t"], kp["emb_i_t"],
      kp["w1u_t"], kp["w1i_t"], kp["b1"],
      kp["w2_t"], kp["b2"],
      kp["w3_t"], kp["b3"],
      kp["wo_t"], kp["bo"])

    # (1, B) lane-dense kernel output -> (B, 1) to match the module; this is a
    # pure reshape (same row-major data), not a transpose.
    return out.reshape(B, 1)


def forward_ref(user_indices, item_indices, params):
    """Pure-JAX reference for correctness check (original layouts)."""
    u = jnp.take(params["emb_user"], user_indices, axis=0)
    i = jnp.take(params["emb_item"], item_indices, axis=0)
    v = jnp.concatenate([u, i], axis=-1)
    v = jnp.maximum(v @ params["w1"] + params["b1"], 0.0)
    v = jnp.maximum(v @ params["w2"] + params["b2"], 0.0)
    v = jnp.maximum(v @ params["w3"] + params["b3"], 0.0)
    return jax.nn.sigmoid(v @ params["wo"] + params["bo"])


if __name__ == "__main__":
    key = jax.random.PRNGKey(0)
    k_param, k_user, k_item = jax.random.split(key, 3)

    params = init_params(k_param)
    kparams = prepare_kernel_params(params)   # one-time layout prep

    user_indices = jax.random.randint(k_user, (BATCH,), 0, NUM_USERS, jnp.int32)
    item_indices = jax.random.randint(k_item, (BATCH,), 0, NUM_ITEMS, jnp.int32)

    rating = forward(user_indices, item_indices, kparams)
    jax.block_until_ready(rating)

    ref = forward_ref(user_indices, item_indices, params)
    assert rating.shape == (BATCH, 1)
    assert jnp.allclose(rating, ref, atol=1e-5, rtol=1e-5), "mismatch vs reference"

    print("KERNEL_OK")
</pallas_src>

<mosaic_0001>
module attributes {stable_mosaic.version = 11 : i64} {
  func.func @_mlp_kernel(%arg0: i32, %arg1: memref<1x8xi32, #tpu.memory_space<vmem>>, %arg2: memref<1x8xi32, #tpu.memory_space<vmem>>, %arg3: memref<16x128xf32, #tpu.memory_space<vmem>>, %arg4: memref<16x128xf32, #tpu.memory_space<vmem>>, %arg5: memref<64x16xf32, #tpu.memory_space<vmem>>, %arg6: memref<64x16xf32, #tpu.memory_space<vmem>>, %arg7: memref<64x1xf32, #tpu.memory_space<vmem>>, %arg8: memref<32x64xf32, #tpu.memory_space<vmem>>, %arg9: memref<32x1xf32, #tpu.memory_space<vmem>>, %arg10: memref<16x32xf32, #tpu.memory_space<vmem>>, %arg11: memref<16x1xf32, #tpu.memory_space<vmem>>, %arg12: memref<1x16xf32, #tpu.memory_space<vmem>>, %arg13: memref<1x1xf32, #tpu.memory_space<vmem>>, %arg14: memref<1x8xf32, #tpu.memory_space<vmem>>) attributes {dimension_semantics = [#tpu.dimension_semantics<parallel>], iteration_bounds = array<i64: 1>, scalar_prefetch = 0 : i64, scratch_operands = 0 : i64, tpu.core_type = #tpu.core_type<tc>, window_params = [{transform_indices = @transform_0, window_bounds = array<i64: 1, 8>}, {transform_indices = @transform_1, window_bounds = array<i64: 1, 8>}, {pipeline_mode = #tpu.pipeline_mode<synchronous>, transform_indices = @transform_2, window_bounds = array<i64: 16, 128>}, {pipeline_mode = #tpu.pipeline_mode<synchronous>, transform_indices = @transform_3, window_bounds = array<i64: 16, 128>}, {pipeline_mode = #tpu.pipeline_mode<synchronous>, transform_indices = @transform_4, window_bounds = array<i64: 64, 16>}, {pipeline_mode = #tpu.pipeline_mode<synchronous>, transform_indices = @transform_5, window_bounds = array<i64: 64, 16>}, {pipeline_mode = #tpu.pipeline_mode<synchronous>, transform_indices = @transform_6, window_bounds = array<i64: 64, 1>}, {pipeline_mode = #tpu.pipeline_mode<synchronous>, transform_indices = @transform_7, window_bounds = array<i64: 32, 64>}, {pipeline_mode = #tpu.pipeline_mode<synchronous>, transform_indices = @transform_8, window_bounds = array<i64: 32, 1>}, {pipeline_mode = #tpu.pipeline_mode<synchronous>, transform_indices = @transform_9, window_bounds = array<i64: 16, 32>}, {pipeline_mode = #tpu.pipeline_mode<synchronous>, transform_indices = @transform_10, window_bounds = array<i64: 16, 1>}, {pipeline_mode = #tpu.pipeline_mode<synchronous>, transform_indices = @transform_11, window_bounds = array<i64: 1, 16>}, {pipeline_mode = #tpu.pipeline_mode<synchronous>, transform_indices = @transform_12, window_bounds = array<i64: 1, 1>}, {transform_indices = @transform_13, window_bounds = array<i64: 1, 8>}]} {
    %c0 = arith.constant 0 : index
    %c0_0 = arith.constant 0 : index
    %0 = vector.load %arg1[%c0, %c0_0] : memref<1x8xi32, #tpu.memory_space<vmem>>, vector<1x8xi32>
    %c0_1 = arith.constant 0 : index
    %c0_2 = arith.constant 0 : index
    %1 = vector.load %arg2[%c0_1, %c0_2] : memref<1x8xi32, #tpu.memory_space<vmem>>, vector<1x8xi32>
    %2 = tpu.iota {dimensions = array<i32: 0>} : vector<128x8xi32>
    %3 = vector.broadcast %0 : vector<1x8xi32> to vector<128x8xi32>
    %4 = arith.cmpi eq, %2, %3 : vector<128x8xi32>
    %5 = arith.extui %4 : vector<128x8xi1> to vector<128x8xi32>
    %6 = arith.sitofp %5 : vector<128x8xi32> to vector<128x8xf32>
    %7 = tpu.iota {dimensions = array<i32: 0>} : vector<128x8xi32>
    %8 = vector.broadcast %1 : vector<1x8xi32> to vector<128x8xi32>
    %9 = arith.cmpi eq, %7, %8 : vector<128x8xi32>
    %10 = arith.extui %9 : vector<128x8xi1> to vector<128x8xi32>
    %11 = arith.sitofp %10 : vector<128x8xi32> to vector<128x8xf32>
    %c0_3 = arith.constant 0 : index
    %c0_4 = arith.constant 0 : index
    %12 = vector.load %arg3[%c0_3, %c0_4] : memref<16x128xf32, #tpu.memory_space<vmem>>, vector<16x128xf32>
    %cst = arith.constant dense<0.000000e+00> : vector<16x8xf32>
    %13 = tpu.matmul %12, %6, %cst {dimension_numbers = #tpu.dot_dimension_numbers<[1], [0], [0], [1], [0, 0, 1, 1], [], []>} : vector<16x128xf32>, vector<128x8xf32>, vector<16x8xf32> -> vector<16x8xf32>
    %c0_5 = arith.constant 0 : index
    %c0_6 = arith.constant 0 : index
    %14 = vector.load %arg4[%c0_5, %c0_6] : memref<16x128xf32, #tpu.memory_space<vmem>>, vector<16x128xf32>
    %cst_7 = arith.constant dense<0.000000e+00> : vector<16x8xf32>
    %15 = tpu.matmul %14, %11, %cst_7 {dimension_numbers = #tpu.dot_dimension_numbers<[1], [0], [0], [1], [0, 0, 1, 1], [], []>} : vector<16x128xf32>, vector<128x8xf32>, vector<16x8xf32> -> vector<16x8xf32>
    %c0_8 = arith.constant 0 : index
    %c0_9 = arith.constant 0 : index
    %16 = vector.load %arg5[%c0_8, %c0_9] : memref<64x16xf32, #tpu.memory_space<vmem>>, vector<64x16xf32>
    %cst_10 = arith.constant dense<0.000000e+00> : vector<64x8xf32>
    %17 = tpu.matmul %16, %13, %cst_10 {dimension_numbers = #tpu.dot_dimension_numbers<[1], [0], [0], [1], [0, 0, 1, 1], [], []>} : vector<64x16xf32>, vector<16x8xf32>, vector<64x8xf32> -> vector<64x8xf32>
    %c0_11 = arith.constant 0 : index
    %c0_12 = arith.constant 0 : index
    %18 = vector.load %arg6[%c0_11, %c0_12] : memref<64x16xf32, #tpu.memory_space<vmem>>, vector<64x16xf32>
    %cst_13 = arith.constant dense<0.000000e+00> : vector<64x8xf32>
    %19 = tpu.matmul %18, %15, %cst_13 {dimension_numbers = #tpu.dot_dimension_numbers<[1], [0], [0], [1], [0, 0, 1, 1], [], []>} : vector<64x16xf32>, vector<16x8xf32>, vector<64x8xf32> -> vector<64x8xf32>
    %20 = arith.addf %17, %19 : vector<64x8xf32>
    %c0_14 = arith.constant 0 : index
    %c0_15 = arith.constant 0 : index
    %21 = vector.load %arg7[%c0_14, %c0_15] : memref<64x1xf32, #tpu.memory_space<vmem>>, vector<64x1xf32>
    %22 = vector.broadcast %21 : vector<64x1xf32> to vector<64x8xf32>
    %23 = arith.addf %20, %22 : vector<64x8xf32>
    %cst_16 = arith.constant 0.000000e+00 : f32
    %24 = vector.broadcast %cst_16 : f32 to vector<64x8xf32>
    %25 = arith.maximumf %23, %24 : vector<64x8xf32>
    %c0_17 = arith.constant 0 : index
    %c0_18 = arith.constant 0 : index
    %26 = vector.load %arg8[%c0_17, %c0_18] : memref<32x64xf32, #tpu.memory_space<vmem>>, vector<32x64xf32>
    %cst_19 = arith.constant dense<0.000000e+00> : vector<32x8xf32>
    %27 = tpu.matmul %26, %25, %cst_19 {dimension_numbers = #tpu.dot_dimension_numbers<[1], [0], [0], [1], [0, 0, 1, 1], [], []>} : vector<32x64xf32>, vector<64x8xf32>, vector<32x8xf32> -> vector<32x8xf32>
    %c0_20 = arith.constant 0 : index
    %c0_21 = arith.constant 0 : index
    %28 = vector.load %arg9[%c0_20, %c0_21] : memref<32x1xf32, #tpu.memory_space<vmem>>, vector<32x1xf32>
    %29 = vector.broadcast %28 : vector<32x1xf32> to vector<32x8xf32>
    %30 = arith.addf %27, %29 : vector<32x8xf32>
    %cst_22 = arith.constant 0.000000e+00 : f32
    %31 = vector.broadcast %cst_22 : f32 to vector<32x8xf32>
    %32 = arith.maximumf %30, %31 : vector<32x8xf32>
    %c0_23 = arith.constant 0 : index
    %c0_24 = arith.constant 0 : index
    %33 = vector.load %arg10[%c0_23, %c0_24] : memref<16x32xf32, #tpu.memory_space<vmem>>, vector<16x32xf32>
    %cst_25 = arith.constant dense<0.000000e+00> : vector<16x8xf32>
    %34 = tpu.matmul %33, %32, %cst_25 {dimension_numbers = #tpu.dot_dimension_numbers<[1], [0], [0], [1], [0, 0, 1, 1], [], []>} : vector<16x32xf32>, vector<32x8xf32>, vector<16x8xf32> -> vector<16x8xf32>
    %c0_26 = arith.constant 0 : index
    %c0_27 = arith.constant 0 : index
    %35 = vector.load %arg11[%c0_26, %c0_27] : memref<16x1xf32, #tpu.memory_space<vmem>>, vector<16x1xf32>
    %36 = vector.broadcast %35 : vector<16x1xf32> to vector<16x8xf32>
    %37 = arith.addf %34, %36 : vector<16x8xf32>
    %cst_28 = arith.constant 0.000000e+00 : f32
    %38 = vector.broadcast %cst_28 : f32 to vector<16x8xf32>
    %39 = arith.maximumf %37, %38 : vector<16x8xf32>
    %c0_29 = arith.constant 0 : index
    %c0_30 = arith.constant 0 : index
    %40 = vector.load %arg12[%c0_29, %c0_30] : memref<1x16xf32, #tpu.memory_space<vmem>>, vector<1x16xf32>
    %cst_31 = arith.constant dense<0.000000e+00> : vector<1x8xf32>
    %41 = tpu.matmul %40, %39, %cst_31 {dimension_numbers = #tpu.dot_dimension_numbers<[1], [0], [0], [1], [0, 0, 1, 1], [], []>} : vector<1x16xf32>, vector<16x8xf32>, vector<1x8xf32> -> vector<1x8xf32>
    %c0_32 = arith.constant 0 : index
    %c0_33 = arith.constant 0 : index
    %42 = vector.load %arg13[%c0_32, %c0_33] : memref<1x1xf32, #tpu.memory_space<vmem>>, vector<1x1xf32>
    %43 = vector.broadcast %42 : vector<1x1xf32> to vector<1x8xf32>
    %44 = arith.addf %41, %43 : vector<1x8xf32>
    %45 = arith.negf %44 : vector<1x8xf32>
    %46 = math.exp %45 : vector<1x8xf32>
    %cst_34 = arith.constant 1.000000e+00 : f32
    %47 = vector.broadcast %cst_34 : f32 to vector<1x8xf32>
    %48 = arith.addf %47, %46 : vector<1x8xf32>
    %49 = arith.divf %47, %48 : vector<1x8xf32>
    %c0_35 = arith.constant 0 : index
    %c0_36 = arith.constant 0 : index
    %50 = vector.load %arg14[%c0_35, %c0_36] : memref<1x8xf32, #tpu.memory_space<vmem>>, vector<1x8xf32>
    tpu.vector_store %arg14[%c0_35, %c0_36], %49 {strides = array<i32>} : memref<1x8xf32, #tpu.memory_space<vmem>>, vector<1x8xf32>,
    return
  }
  func.func @transform_0(%arg0: i32) -> (i32, i32) {
    %c0_i32 = arith.constant 0 : i32
    %c0_i32_0 = arith.constant 0 : i32
    return %c0_i32, %arg0 : i32, i32
  }
  func.func @transform_1(%arg0: i32) -> (i32, i32) {
    %c0_i32 = arith.constant 0 : i32
    %c0_i32_0 = arith.constant 0 : i32
    return %c0_i32, %arg0 : i32, i32
  }
  func.func @transform_2(%arg0: i32) -> (i32, i32) {
    %c0_i32 = arith.constant 0 : i32
    %c0_i32_0 = arith.constant 0 : i32
    %c0_i32_1 = arith.constant 0 : i32
    return %c0_i32, %c0_i32_0 : i32, i32
  }
  func.func @transform_3(%arg0: i32) -> (i32, i32) {
    %c0_i32 = arith.constant 0 : i32
    %c0_i32_0 = arith.constant 0 : i32
    %c0_i32_1 = arith.constant 0 : i32
    return %c0_i32, %c0_i32_0 : i32, i32
  }
  func.func @transform_4(%arg0: i32) -> (i32, i32) {
    %c0_i32 = arith.constant 0 : i32
    %c0_i32_0 = arith.constant 0 : i32
    %c0_i32_1 = arith.constant 0 : i32
    return %c0_i32, %c0_i32_0 : i32, i32
  }
  func.func @transform_5(%arg0: i32) -> (i32, i32) {
    %c0_i32 = arith.constant 0 : i32
    %c0_i32_0 = arith.constant 0 : i32
    %c0_i32_1 = arith.constant 0 : i32
    return %c0_i32, %c0_i32_0 : i32, i32
  }
  func.func @transform_6(%arg0: i32) -> (i32, i32) {
    %c0_i32 = arith.constant 0 : i32
    %c0_i32_0 = arith.constant 0 : i32
    %c0_i32_1 = arith.constant 0 : i32
    return %c0_i32, %c0_i32_0 : i32, i32
  }
  func.func @transform_7(%arg0: i32) -> (i32, i32) {
    %c0_i32 = arith.constant 0 : i32
    %c0_i32_0 = arith.constant 0 : i32
    %c0_i32_1 = arith.constant 0 : i32
    return %c0_i32, %c0_i32_0 : i32, i32
  }
  func.func @transform_8(%arg0: i32) -> (i32, i32) {
    %c0_i32 = arith.constant 0 : i32
    %c0_i32_0 = arith.constant 0 : i32
    %c0_i32_1 = arith.constant 0 : i32
    return %c0_i32, %c0_i32_0 : i32, i32
  }
  func.func @transform_9(%arg0: i32) -> (i32, i32) {
    %c0_i32 = arith.constant 0 : i32
    %c0_i32_0 = arith.constant 0 : i32
    %c0_i32_1 = arith.constant 0 : i32
    return %c0_i32, %c0_i32_0 : i32, i32
  }
  func.func @transform_10(%arg0: i32) -> (i32, i32) {
    %c0_i32 = arith.constant 0 : i32
    %c0_i32_0 = arith.constant 0 : i32
    %c0_i32_1 = arith.constant 0 : i32
    return %c0_i32, %c0_i32_0 : i32, i32
  }
  func.func @transform_11(%arg0: i32) -> (i32, i32) {
    %c0_i32 = arith.constant 0 : i32
    %c0_i32_0 = arith.constant 0 : i32
    %c0_i32_1 = arith.constant 0 : i32
    return %c0_i32, %c0_i32_0 : i32, i32
  }
  func.func @transform_12(%arg0: i32) -> (i32, i32) {
    %c0_i32 = arith.constant 0 : i32
    %c0_i32_0 = arith.constant 0 : i32
    %c0_i32_1 = arith.constant 0 : i32
    return %c0_i32, %c0_i32_0 : i32, i32
  }
  func.func @transform_13(%arg0: i32) -> (i32, i32) {
    %c0_i32 = arith.constant 0 : i32
    %c0_i32_0 = arith.constant 0 : i32
    return %c0_i32, %arg0 : i32, i32
  }
}

</mosaic_0001>

<bundles_post_ra>
// kernel: tpu_custom_call.1
= control target key start
LH: loop header
LB: loop body
LE: loop exit
PB: predicated region body
PF: predicated region fallthrough
CT: control target
= control target key end

     0   :  { %s1692_s0 = inlined_call_operand.vmem [shape: s32[1,8], index: 0, kind: input, shape index: {}]   ;;  %s1693_s1 = inlined_call_operand.vmem [shape: s32[1,8], index: 1, kind: input, shape index: {}]   ;;  %s1694_s2 = inlined_call_operand.vmem [shape: f32[16,128], index: 2, kind: input, shape index: {}]   ;;  %s1695_s3 = inlined_call_operand.vmem [shape: f32[16,128], index: 3, kind: input, shape index: {}]   ;;  %s1696_s4 = inlined_call_operand.vmem [shape: f32[64,16], index: 4, kind: input, shape index: {}]   ;;  %s1697_s5 = inlined_call_operand.vmem [shape: f32[64,16], index: 5, kind: input, shape index: {}]   ;;  %s1698_s6 = inlined_call_operand.vmem [shape: f32[64,1], index: 6, kind: input, shape index: {}]   ;;  %s1699_s7 = inlined_call_operand.vmem [shape: f32[32,64], index: 7, kind: input, shape index: {}]   ;;  %s1700_s8 = inlined_call_operand.vmem [shape: f32[32,1], index: 8, kind: input, shape index: {}]   ;;  %s1701_s9 = inlined_call_operand.vmem [shape: f32[16,32], index: 9, kind: input, shape index: {}]   ;;  %s1702_s10 = inlined_call_operand.vmem [shape: f32[16,1], index: 10, kind: input, shape index: {}]   ;;  %s1703_s11 = inlined_call_operand.vmem [shape: f32[1,16], index: 11, kind: input, shape index: {}]   ;;  %s1704_s12 = inlined_call_operand.<no memory space> [shape: f32[1,1], index: 12, kind: input, shape index: {}]   ;;  %s1705_s13 = inlined_call_operand.hbm [shape: f32[1,8], index: 13, kind: output, shape index: {}]  }
   0x1   :  { %v18_v0 = vstv %s1704_s12 }
   0x2   :  { %19 = vst [vmem:[#allocation2] sm:$0x1] %v18_v0 }
   0x3   :  { %v49_v1 = vlaneseq  ;;  %v170_v2 = vld [vmem:[%s1694_s2] sm:$0xff] }
   0x4   :  { %1196 = vmatprep.mubr.f32.mxu0 %v170_v2  ;;  %v247_v3 = vld [vmem:[%s1695_s3] sm:$0xff] }
   0x5   :  { %v1423_v4 = vshrl.u32 %v49_v1, 7  ;;  %1231 = vmatprep.mubr.f32.mxu1 %v247_v3 }
   0x6   :  { %20 = vsyncpa [#allocation4], 0  ;;  %v1428_v5 = vld [vmem:[%s1692_s0] ss:$0 sm:$0xff]  ;;  %v1339_v11 = vmov 1.0   ;;  %v171_v23 = vld [vmem:[%s1694_s2 + $0x8] sm:$0xff] }
   0x7   :  { %v1433_v6 = vld [vmem:[%s1693_s1] ss:$0 sm:$0xff]  ;;  %v65_v7 = vadd.s32 120, %v1423_v4  ;;  %v64_v8 = vadd.s32 112, %v1423_v4  ;;  %v63_v9 = vadd.s32 104, %v1423_v4  ;;  %v62_v10 = vadd.s32 96, %v1423_v4 }
   0x8   :  { %v61_v12 = vadd.s32 88, %v1423_v4  ;;  %v60_v13 = vadd.s32 80, %v1423_v4  ;;  %v59_v14 = vadd.s32 72, %v1423_v4  ;;  %v58_v15 = vadd.s32 64, %v1423_v4  ;;  %v248_v24 = vld [vmem:[%s1695_s3 + $0x8] sm:$0xff]  ;;  %v332_v25 = vld [vmem:[%s1697_s5] sm:$0xff] }
   0x9   :  { %vm85_vm0 = vcmp.eq.s32.totalorder %v65_v7, %v1428_v5  ;;  %vm137_vm1 = vcmp.eq.s32.totalorder %v65_v7, %v1433_v6  ;;  %vm84_vm2 = vcmp.eq.s32.totalorder %v64_v8, %v1428_v5  ;;  %vm136_vm3 = vcmp.eq.s32.totalorder %v64_v8, %v1433_v6  ;;  %v324_v26 = vld [vmem:[%s1696_s4] sm:$0xff]  ;;  %v606_v27 = vld [vmem:[%s1698_s6 + $0x38] sm:$0xff]  ;;  %v604_v28 = vld [vmem:[%s1698_s6 + $0x28] sm:$0xff] }
   0xa   :  { %1164 = vmatprep.subr.msk.mxu0 %vm85_vm0, %v1339_v11  ;;  %1199 = vmatprep.subr.msk.mxu1 %vm137_vm1, %v1339_v11  ;;  %vm83_vm4 = vcmp.eq.s32.totalorder %v63_v9, %v1428_v5  ;;  %vm135_vm5 = vcmp.eq.s32.totalorder %v63_v9, %v1433_v6  ;;  %vm82_vm6 = vcmp.eq.s32.totalorder %v62_v10, %v1428_v5  ;;  %v57_v16 = vadd.s32 56, %v1423_v4  ;;  %v605_v30 = vld [vmem:[%s1698_s6 + $0x30] sm:$0xff]  ;;  %v603_v31 = vld [vmem:[%s1698_s6 + $0x20] sm:$0xff]  ;;  %v602_v32 = vld [vmem:[%s1698_s6 + $0x18] sm:$0xff] }
   0xb   :  { %1165 = vmatpush3.msk.msra.mxu0 %vm85_vm0, %v1339_v11  ;;  %1200 = vmatpush3.msk.msra.mxu1 %vm137_vm1, %v1339_v11  ;;  %vm134_vm7 = vcmp.eq.s32.totalorder %v62_v10, %v1433_v6  ;;  %vm81_vm8 = vcmp.eq.s32.totalorder %v61_v12, %v1428_v5  ;;  %vm133_vm9 = vcmp.eq.s32.totalorder %v61_v12, %v1433_v6  ;;  %v56_v17 = vadd.s32 48, %v1423_v4  ;;  %v601_v33 = vld [vmem:[%s1698_s6 + $0x10] sm:$0xff]  ;;  %v600_v34 = vld [vmem:[%s1698_s6 + $0x8] sm:$0xff]  ;;  %v599_v35 = vld [vmem:[%s1698_s6] sm:$0xff] }
   0xc   :  { %1166 = vmatprep.subr.msk.mxu0 %vm84_vm2, %v1339_v11  ;;  %1201 = vmatprep.subr.msk.mxu1 %vm136_vm3, %v1339_v11  ;;  %vm80_vm10 = vcmp.eq.s32.totalorder %v60_v13, %v1428_v5  ;;  %vm132_vm11 = vcmp.eq.s32.totalorder %v60_v13, %v1433_v6  ;;  %vm79_vm12 = vcmp.eq.s32.totalorder %v59_v14, %v1428_v5  ;;  %v55_v18 = vadd.s32 40, %v1423_v4  ;;  %v670_v36 = vld [vmem:[%s1700_s8 + $0x18] sm:$0xff]  ;;  %v669_v37 = vld [vmem:[%s1700_s8 + $0x10] sm:$0xff]  ;;  %v668_v38 = vld [vmem:[%s1700_s8 + $0x8] sm:$0xff] }
   0xd   :  { %1167 = vmatpush3.msk.msra.mxu0 %vm84_vm2, %v1339_v11  ;;  %1202 = vmatpush3.msk.msra.mxu1 %vm136_vm3, %v1339_v11  ;;  %vm131_vm13 = vcmp.eq.s32.totalorder %v59_v14, %v1433_v6  ;;  %vm78_vm14 = vcmp.eq.s32.totalorder %v58_v15, %v1428_v5  ;;  %vm130_vm15 = vcmp.eq.s32.totalorder %v58_v15, %v1433_v6  ;;  %v54_v19 = vadd.s32 32, %v1423_v4  ;;  %v667_v39 = vld [vmem:[%s1700_s8] sm:$0xff]  ;;  %v796_v40 = vld [vmem:[%s1702_s10 + $0x8] sm:$0xff]  ;;  %v334_v49 = vld [vmem:[%s1697_s5 + $0x10] sm:$0xff] }
   0xe   :  { %1168 = vmatprep.subr.msk.mxu0 %vm83_vm4, %v1339_v11  ;;  %1203 = vmatprep.subr.msk.mxu1 %vm135_vm5, %v1339_v11  ;;  %vm77_vm0 = vcmp.eq.s32.totalorder %v57_v16, %v1428_v5  ;;  %vm129_vm1 = vcmp.eq.s32.totalorder %v57_v16, %v1433_v6  ;;  %vm76_vm2 = vcmp.eq.s32.totalorder %v56_v17, %v1428_v5  ;;  %v53_v20 = vadd.s32 24, %v1423_v4  ;;  %v795_v41 = vld [vmem:[%s1702_s10] sm:$0xff]  ;;  %v333_v47 = vld [vmem:[%s1697_s5 + $0x8] sm:$0xff]  ;;  %v326_v50 = vld [vmem:[%s1696_s4 + $0x10] sm:$0xff] }
   0xf   :  { %1169 = vmatpush3.msk.msra.mxu0 %vm83_vm4, %v1339_v11  ;;  %1204 = vmatpush3.msk.msra.mxu1 %vm135_vm5, %v1339_v11  ;;  %vm128_vm3 = vcmp.eq.s32.totalorder %v56_v17, %v1433_v6  ;;  %vm75_vm4 = vcmp.eq.s32.totalorder %v55_v18, %v1428_v5  ;;  %vm127_vm5 = vcmp.eq.s32.totalorder %v55_v18, %v1433_v6  ;;  %v52_v21 = vadd.s32 16, %v1423_v4  ;;  %v892_v42 = vld [vmem:[#allocation2] sm:$0x1]  ;;  %v325_v48 = vld [vmem:[%s1696_s4 + $0x8] sm:$0xff]  ;;  %v335_v51 = vld [vmem:[%s1697_s5 + $0x18] sm:$0xff] }
  0x10   :  { %1170 = vmatprep.subr.msk.mxu0 %vm82_vm6, %v1339_v11  ;;  %1205 = vmatprep.subr.msk.mxu1 %vm134_vm7, %v1339_v11  ;;  %v51_v22 = vadd.s32 8, %v1423_v4  ;;  %v1340_v29 = vmov 0   ;;  %v327_v52 = vld [vmem:[%s1696_s4 + $0x18] sm:$0xff]  ;;  %v336_v53 = vld [vmem:[%s1697_s5 + $0x20] sm:$0xff]  ;;  %v337_v55 = vld [vmem:[%s1697_s5 + $0x28] sm:$0xff] }
  0x11   :  { %1171 = vmatpush3.msk.msra.mxu0 %vm82_vm6, %v1339_v11  ;;  %1206 = vmatpush3.msk.msra.mxu1 %vm134_vm7, %v1339_v11  ;;  %vm74_vm6 = vcmp.eq.s32.totalorder %v54_v19, %v1428_v5  ;;  %vm126_vm7 = vcmp.eq.s32.totalorder %v54_v19, %v1433_v6  ;;  %v328_v54 = vld [vmem:[%s1696_s4 + $0x20] sm:$0xff]  ;;  %v329_v56 = vld [vmem:[%s1696_s4 + $0x28] sm:$0xff]  ;;  %v338_v57 = vld [vmem:[%s1697_s5 + $0x30] sm:$0xff] }
  0x12   :  { %1172 = vmatprep.subr.msk.mxu0 %vm81_vm8, %v1339_v11  ;;  %1207 = vmatprep.subr.msk.mxu1 %vm133_vm9, %v1339_v11  ;;  %v330_v58 = vld [vmem:[%s1696_s4 + $0x30] sm:$0xff]  ;;  %v339_v59 = vld [vmem:[%s1697_s5 + $0x38] sm:$0xff]  ;;  %v663_v61 = vld [vmem:[%s1699_s7] sm:$0xff] }
  0x13   :  { %1173 = vmatpush3.msk.msra.mxu0 %vm81_vm8, %v1339_v11  ;;  %1208 = vmatpush3.msk.msra.mxu1 %vm133_vm9, %v1339_v11  ;;  %vm73_vm8 = vcmp.eq.s32.totalorder %v53_v20, %v1428_v5  ;;  %vm125_vm9 = vcmp.eq.s32.totalorder %v53_v20, %v1433_v6  ;;  %v331_v60 = vld [vmem:[%s1696_s4 + $0x38] sm:$0xff] }
  0x14   :  { %1174 = vmatprep.subr.msk.mxu0 %vm80_vm10, %v1339_v11  ;;  %1209 = vmatprep.subr.msk.mxu1 %vm132_vm11, %v1339_v11 }
  0x15   :  { %1175 = vmatpush3.msk.msra.mxu0 %vm80_vm10, %v1339_v11  ;;  %1210 = vmatpush3.msk.msra.mxu1 %vm132_vm11, %v1339_v11  ;;  %vm72_vm10 = vcmp.eq.s32.totalorder %v52_v21, %v1428_v5  ;;  %vm124_vm11 = vcmp.eq.s32.totalorder %v52_v21, %v1433_v6 }
  0x16   :  { %1176 = vmatprep.subr.msk.mxu0 %vm79_vm12, %v1339_v11  ;;  %1211 = vmatprep.subr.msk.mxu1 %vm131_vm13, %v1339_v11 }
  0x17   :  { %1177 = vmatpush3.msk.msra.mxu0 %vm79_vm12, %v1339_v11  ;;  %1212 = vmatpush3.msk.msra.mxu1 %vm131_vm13, %v1339_v11  ;;  %vm71_vm12 = vcmp.eq.s32.totalorder %v51_v22, %v1428_v5  ;;  %vm123_vm13 = vcmp.eq.s32.totalorder %v51_v22, %v1433_v6 }
  0x18   :  { %1178 = vmatprep.subr.msk.mxu0 %vm78_vm14, %v1339_v11  ;;  %1213 = vmatprep.subr.msk.mxu1 %vm130_vm15, %v1339_v11 }
  0x19   :  { %1179 = vmatpush3.msk.msra.mxu0 %vm78_vm14, %v1339_v11  ;;  %1214 = vmatpush3.msk.msra.mxu1 %vm130_vm15, %v1339_v11  ;;  %vm70_vm14 = vcmp.eq.s32.totalorder %v1423_v4, %v1428_v5  ;;  %vm122_vm15 = vcmp.eq.s32.totalorder %v1423_v4, %v1433_v6 }
  0x1a   :  { %1180 = vmatprep.subr.msk.mxu0 %vm77_vm0, %v1339_v11  ;;  %1215 = vmatprep.subr.msk.mxu1 %vm129_vm1, %v1339_v11 }
  0x1b   :  { %1181 = vmatpush3.msk.msra.mxu0 %vm77_vm0, %v1339_v11  ;;  %1216 = vmatpush3.msk.msra.mxu1 %vm129_vm1, %v1339_v11  ;;  %vm340_vm0 = vcmask 130048   ;;  %vm691_vm1 = vcmask 523264  }
  0x1c   :  { %1182 = vmatprep.subr.msk.mxu0 %vm76_vm2, %v1339_v11  ;;  %1217 = vmatprep.subr.msk.mxu1 %vm128_vm3, %v1339_v11 }
  0x1d   :  { %1183 = vmatpush3.msk.msra.mxu0 %vm76_vm2, %v1339_v11  ;;  %1218 = vmatpush3.msk.msra.mxu1 %vm128_vm3, %v1339_v11  ;;  %vm807_vm2 = vcmask 261120   ;;  %vm1342_vm3 = vmmov 0  }
  0x1e   :  { %1184 = vmatprep.subr.msk.mxu0 %vm75_vm4, %v1339_v11  ;;  %1219 = vmatprep.subr.msk.mxu1 %vm127_vm5, %v1339_v11 }
  0x1f   :  { %1185 = vmatpush3.msk.msra.mxu0 %vm75_vm4, %v1339_v11  ;;  %1220 = vmatpush3.msk.msra.mxu1 %vm127_vm5, %v1339_v11  ;;  %vm981_vm4 = vcmask 57344  }
  0x20   :  { %1186 = vmatprep.subr.msk.mxu0 %vm74_vm6, %v1339_v11  ;;  %1221 = vmatprep.subr.msk.mxu1 %vm126_vm7, %v1339_v11 }
  0x21   :  { %1187 = vmatpush3.msk.msra.mxu0 %vm74_vm6, %v1339_v11  ;;  %1222 = vmatpush3.msk.msra.mxu1 %vm126_vm7, %v1339_v11 }
  0x22   :  { %1188 = vmatprep.subr.msk.mxu0 %vm73_vm8, %v1339_v11  ;;  %1223 = vmatprep.subr.msk.mxu1 %vm125_vm9, %v1339_v11 }
  0x23   :  { %1189 = vmatpush3.msk.msra.mxu0 %vm73_vm8, %v1339_v11  ;;  %1224 = vmatpush3.msk.msra.mxu1 %vm125_vm9, %v1339_v11 }
  0x24   :  { %1190 = vmatprep.subr.msk.mxu0 %vm72_vm10, %v1339_v11  ;;  %1225 = vmatprep.subr.msk.mxu1 %vm124_vm11, %v1339_v11 }
  0x25   :  { %1191 = vmatpush3.msk.msra.mxu0 %vm72_vm10, %v1339_v11  ;;  %1226 = vmatpush3.msk.msra.mxu1 %vm124_vm11, %v1339_v11 }
  0x26   :  { %1192 = vmatprep.subr.msk.mxu0 %vm71_vm12, %v1339_v11  ;;  %1227 = vmatprep.subr.msk.mxu1 %vm123_vm13, %v1339_v11 }
  0x27   :  { %1193 = vmatpush3.msk.msra.mxu0 %vm71_vm12, %v1339_v11  ;;  %1228 = vmatpush3.msk.msra.mxu1 %vm123_vm13, %v1339_v11 }
  0x28   :  { %1194 = vmatprep.subr.msk.mxu0 %vm70_vm14, %v1339_v11  ;;  %1229 = vmatprep.subr.msk.mxu1 %vm122_vm15, %v1339_v11 }
  0x29   :  { %1195 = vmatpush3.msk.msra.mxu0 %vm70_vm14, %v1339_v11  ;;  %1230 = vmatpush3.msk.msra.mxu1 %vm122_vm15, %v1339_v11 }
  0x2a   :  { %1197 = vmatmul.mubr.f32.vlgmr.msra.gmra.mxu0 %v171_v23  ;;  %1232 = vmatmul.mubr.f32.vlgmr.msra.gmra.mxu1 %v248_v24 }
  0x2b   :  { %1238 = vmatprep.mubr.msk.f32.mxu0 %vm340_vm0, %v332_v25  ;;  %1254 = vmatprep.mubr.msk.f32.mxu1 %vm340_vm0, %v324_v26 }
  0x2c   :  { %1311 = vset.pattern.permute.xlu0 %v1340_v29  ;;  %1312 = vset.pattern.permute.xlu1 %v1340_v29 }
  0x2d   :  { %644 = vperm.xlu0 %1311, %v606_v27   ;;  %634 = vperm.xlu1 %1312, %v604_v28  }
  0x31   :  { %639 = vperm.xlu0 %1311, %v605_v30   ;;  %629 = vperm.xlu1 %1312, %v603_v31  }
  0x35   :  { %624 = vperm.xlu0 %1311, %v602_v32   ;;  %619 = vperm.xlu1 %1312, %v601_v33  }
  0x39   :  { %614 = vperm.xlu0 %1311, %v600_v34   ;;  %609 = vperm.xlu1 %1312, %v599_v35  }
  0x3d   :  { %688 = vperm.xlu0 %1311, %v670_v36   ;;  %683 = vperm.xlu1 %1312, %v669_v37  }
  0x41   :  { %678 = vperm.xlu0 %1311, %v668_v38   ;;  %673 = vperm.xlu1 %1312, %v667_v39  }
  0x45   :  { %804 = vperm.xlu0 %1311, %v796_v40   ;;  %799 = vperm.xlu1 %1312, %v795_v41  }
  0x49   :  { %895 = vperm.xlu0 %1311, %v892_v42  }
  0xa8   :  { %v645_v5 = vpop.permute.xlu0 %644  ;;  %v635_v6 = vpop.permute.xlu1 %634 }
  0xac   :  { %v640_v13 = vpop.permute.xlu0 %639  ;;  %v630_v14 = vpop.permute.xlu1 %629 }
  0xb0   :  { %v625_v28 = vpop.permute.xlu0 %624  ;;  %v620_v29 = vpop.permute.xlu1 %619 }
  0xb4   :  { %v615_v39 = vpop.permute.xlu0 %614  ;;  %v610_v40 = vpop.permute.xlu1 %609 }
  0xea   :  { %v1198_v43 = vpop.f32.mrf.mxu0  ;;  %v1233_v44 = vpop.f32.mrf.mxu1 }
  0xeb   :  { %1234 = vmatprep.subr.mxu0 %v1233_v44  ;;  %1250 = vmatprep.subr.mxu1 %v1198_v43 }
  0xec   :  { %v238_v45 = vpop.f32.mrf.mxu0  ;;  %v315_v46 = vpop.f32.mrf.mxu1  ;;  %1235 = vmatpush3.msra.mxu0 %v1233_v44  ;;  %1251 = vmatpush3.msra.mxu1 %v1198_v43 }
  0xed   :  { %1236 = vmatprep.subr.mxu0 %v315_v46  ;;  %1252 = vmatprep.subr.mxu1 %v238_v45 }
  0xee   :  { %1237 = vmatpush3.msra.mxu0 %v315_v46  ;;  %1253 = vmatpush3.msra.mxu1 %v238_v45 }
  0xef   :  { %1239 = vmatmul.mubr.msk.f32.vlgmr.msra.gmra.mxu0 %vm340_vm0, %v333_v47  ;;  %1255 = vmatmul.mubr.msk.f32.vlgmr.msra.gmra.mxu1 %vm340_vm0, %v325_v48  ;;  %v664_v47 = vld [vmem:[%s1699_s7 + $0x8] sm:$0xff]  ;;  %v665_v48 = vld [vmem:[%s1699_s7 + $0x10] sm:$0xff] }
  0xf0   :  { %1241 = vmatprep.mubr.msk.f32.mxu0 %vm340_vm0, %v334_v49  ;;  %1257 = vmatprep.mubr.msk.f32.mxu1 %vm340_vm0, %v326_v50  ;;  %v666_v49 = vld [vmem:[%s1699_s7 + $0x18] sm:$0xff]  ;;  %v793_v50 = vld [vmem:[%s1701_s9] sm:$0xff] }
  0xf3   :  { %1242 = vmatmul.mubr.msk.f32.gmra.mxu0 %vm340_vm0, %v335_v51  ;;  %1258 = vmatmul.mubr.msk.f32.gmra.mxu1 %vm340_vm0, %v327_v52  ;;  %v689_v51 = vpop.permute.xlu0 %688 }
  0xf4   :  { %1244 = vmatprep.mubr.msk.f32.mxu0 %vm340_vm0, %v336_v53  ;;  %1260 = vmatprep.mubr.msk.f32.mxu1 %vm340_vm0, %v328_v54  ;;  %v684_v53 = vpop.permute.xlu1 %683 }
  0xf7   :  { %1245 = vmatmul.mubr.msk.f32.gmra.mxu0 %vm340_vm0, %v337_v55  ;;  %1261 = vmatmul.mubr.msk.f32.gmra.mxu1 %vm340_vm0, %v329_v56 }
  0xf8   :  { %1247 = vmatprep.mubr.msk.f32.mxu0 %vm340_vm0, %v338_v57  ;;  %1263 = vmatprep.mubr.msk.f32.mxu1 %vm340_vm0, %v330_v58  ;;  %v679_v57 = vpop.permute.xlu0 %678 }
  0xfb   :  { %1248 = vmatmul.mubr.msk.f32.gmra.mxu0 %vm340_vm0, %v339_v59  ;;  %1264 = vmatmul.mubr.msk.f32.gmra.mxu1 %vm340_vm0, %v331_v60 }
  0xfc   :  { %1282 = vmatprep.mubr.msk.f32.mxu0 %vm691_vm1, %v663_v61  ;;  %1296 = vmatprep.mubr.msk.f32.mxu1 %vm807_vm2, %v793_v50 }
 0x1af   :  { %v1240_v62 = vpop.f32.mrf.mxu0  ;;  %v1256_v63 = vpop.f32.mrf.mxu1 }
 0x1b0   :  { %v566_v33 = vadd.f32 %v1256_v63, %v1240_v62  ;;  %v674_v62 = vpop.permute.xlu1 %673 }
 0x1b1   :  { %v431_v0 = vpop.f32.mrf.mxu0  ;;  %v560_v1 = vpop.f32.mrf.mxu1 }
 0x1b2   :  { %v561_v36 = vadd.f32 %v560_v1, %v431_v0  ;;  %v648_v41 = vadd.f32 %v615_v39, %v566_v33 }
 0x1b3   :  { %v1243_v2 = vpop.f32.mrf.mxu0  ;;  %v1259_v3 = vpop.f32.mrf.mxu1 }
 0x1b4   :  { %v576_v24 = vadd.f32 %v1259_v3, %v1243_v2  ;;  %v647_v43 = vadd.f32 %v610_v40, %v561_v36  ;;  %v656_v45 = vmax.f32 %v648_v41, 0.0  ;;  %v794_v3 = vld [vmem:[%s1701_s9 + $0x8] sm:$0xff]  ;;  %s1343_s9 = smov [#allocation3]  }
 0x1b5   :  { %v441_v7 = vpop.f32.mrf.mxu0  ;;  %v570_v8 = vpop.f32.mrf.mxu1  ;;  %s989_s18 = sshll.u32 %s1343_s9, 4  ;;  %s990_s18 = int_to_ptr.vmem [resolvable:$true] %s989_s18 }
 0x1b6   :  { %v571_v30 = vadd.f32 %v570_v8, %v441_v7  ;;  %v650_v34 = vadd.f32 %v625_v28, %v576_v24  ;;  %v655_v46 = vmax.f32 %v647_v43, 0.0  ;;  %s1321_s19 = scalar_lea.vmem %s990_s18, 32  ;;  %p1322_p1 = scmp.lt.s32.totalorder %s990_s18, %s990_s18 }
 0x1b7   :  { %v1246_v9 = vpop.f32.mrf.mxu0  ;;  %v1262_v10 = vpop.f32.mrf.mxu1 }
 0x1b8   :  { %v586_v17 = vadd.f32 %v1262_v10, %v1246_v9  ;;  %v649_v37 = vadd.f32 %v620_v29, %v571_v30  ;;  %v658_v42 = vmax.f32 %v650_v34, 0.0  ;;  %v800_v9 = vpop.permute.xlu1 %799 }
 0x1b9   :  { %v451_v11 = vpop.f32.mrf.mxu0  ;;  %v580_v12 = vpop.f32.mrf.mxu1 }
 0x1ba   :  { %v581_v21 = vadd.f32 %v580_v12, %v451_v11  ;;  %v652_v25 = vadd.f32 %v635_v6, %v586_v17  ;;  %v657_v44 = vmax.f32 %v649_v37, 0.0  ;;  %v805_v6 = vpop.permute.xlu0 %804 }
 0x1bb   :  { %v1249_v15 = vpop.f32.mrf.mxu0  ;;  %v1265_v16 = vpop.f32.mrf.mxu1 }
 0x1bc   :  { %v596_v18 = vadd.f32 %v1265_v16, %v1249_v15  ;;  %v651_v31 = vadd.f32 %v630_v14, %v581_v21  ;;  %v660_v35 = vmax.f32 %v652_v25, 0.0  ;;  %v891_v14 = vld [vmem:[%s1703_s11] sm:$0x1]  ;;  %v900_v15 = vsub.s32 0, %v1423_v4  ;;  %s1317_s11 = scalar_lea.vmem %s990_s18, 16 }
 0x1bd   :  { %v461_v19 = vpop.f32.mrf.mxu0  ;;  %v590_v20 = vpop.f32.mrf.mxu1  ;;  %p1318_p0 = scmp.ne.s32.totalorder %s990_s18, %s1317_s11  ;;  %p1323_p2 = scmp.lt.s32.totalorder %s1321_s19, %s1317_s11 }
 0x1be   :  { %v654_v22 = vadd.f32 %v645_v5, %v596_v18  ;;  %v591_v23 = vadd.f32 %v590_v20, %v461_v19  ;;  %v659_v38 = vmax.f32 %v651_v31, 0.0  ;;  %v1341_v5 = vmov 0.0   ;;  %v896_v16 = vpop.permute.xlu0 %895 }
 0x1bf   :  { %v901_v17 = vrot.slane %v896_v16, %v900_v15  ;;  %p1324_p3 = por %p1323_p2, %p1322_p1 }
 0x1c0   :  { %v662_v26 = vmax.f32 %v654_v22, 0.0  ;;  %v653_v27 = vadd.f32 %v640_v13, %v591_v23 }
 0x1c1   :  { %p1325_p4 = pnand %p1324_p3, %p1318_p0 }
 0x1c2   :  { %v661_v32 = vmax.f32 %v653_v27, 0.0  ;;  %1266 = vmatprep.subr.mxu0 %v662_v26 }
 0x1c3   :  { %1267 = vmatpush3.msra.mxu0 %v662_v26 }
 0x1c4   :  { %1268 = vmatprep.subr.mxu0 %v661_v32 }
 0x1c5   :  { %1269 = vmatpush3.msra.mxu0 %v661_v32 }
 0x1c6   :  { %1270 = vmatprep.subr.mxu0 %v660_v35 }
 0x1c7   :  { %1271 = vmatpush3.msra.mxu0 %v660_v35 }
 0x1c8   :  { %1272 = vmatprep.subr.mxu0 %v659_v38 }
 0x1c9   :  { %1273 = vmatpush3.msra.mxu0 %v659_v38 }
 0x1ca   :  { %1274 = vmatprep.subr.mxu0 %v658_v42 }
 0x1cb   :  { %1275 = vmatpush3.msra.mxu0 %v658_v42 }
 0x1cc   :  { %1276 = vmatprep.subr.mxu0 %v657_v44 }
 0x1cd   :  { %1277 = vmatpush3.msra.mxu0 %v657_v44 }
 0x1ce   :  { %1278 = vmatprep.subr.mxu0 %v656_v45 }
 0x1cf   :  { %1279 = vmatpush3.msra.mxu0 %v656_v45 }
 0x1d0   :  { %1280 = vmatprep.subr.mxu0 %v655_v46 }
 0x1d1   :  { %1281 = vmatpush3.msra.mxu0 %v655_v46 }
 0x1d2   :  { %1283 = vmatmul.mubr.msk.f32.vlgmr.msra.gmra.mxu0 %vm691_vm1, %v664_v47 }
 0x1d3   :  { %1285 = vmatprep.mubr.msk.f32.mxu0 %vm691_vm1, %v665_v48 }
 0x1d6   :  { %1286 = vmatmul.mubr.msk.f32.gmra.mxu0 %vm691_vm1, %v666_v49 }
 0x292   :  { %v1284_v52 = vpop.f32.mrf.mxu0 }
 0x293   :  { %v776_v59 = vadd.f32 %v1284_v52, %v679_v57 }
 0x294   :  { %v770_v54 = vpop.f32.mrf.mxu0 }
 0x295   :  { %v771_v63 = vadd.f32 %v770_v54, %v674_v62  ;;  %v790_v1 = vmax.f32 %v776_v59, 0.0 }
 0x296   :  { %v1287_v55 = vpop.f32.mrf.mxu0 }
 0x297   :  { %v786_v56 = vadd.f32 %v1287_v55, %v689_v51  ;;  %v789_v2 = vmax.f32 %v771_v63, 0.0 }
 0x298   :  { %v780_v58 = vpop.f32.mrf.mxu0 }
 0x299   :  { %v792_v60 = vmax.f32 %v786_v56, 0.0  ;;  %v781_v61 = vadd.f32 %v780_v58, %v684_v53 }
 0x29b   :  { %v791_v0 = vmax.f32 %v781_v61, 0.0  ;;  %1288 = vmatprep.subr.mxu1 %v792_v60 }
 0x29c   :  { %1289 = vmatpush3.msra.mxu1 %v792_v60 }
 0x29d   :  { %1290 = vmatprep.subr.mxu1 %v791_v0 }
 0x29e   :  { %1291 = vmatpush3.msra.mxu1 %v791_v0 }
 0x29f   :  { %1292 = vmatprep.subr.mxu1 %v790_v1 }
 0x2a0   :  { %1293 = vmatpush3.msra.mxu1 %v790_v1 }
 0x2a1   :  { %1294 = vmatprep.subr.mxu1 %v789_v2 }
 0x2a2   :  { %1295 = vmatpush3.msra.mxu1 %v789_v2 }
 0x2a3   :  { %1297 = vmatmul.mubr.msk.f32.vlgmr.msra.gmra.mxu1 %vm807_vm2, %v794_v3  ;;  %1299 = vmatprep.subr.mxu1 %v1341_v5 }
 0x2a4   :  { %1303 = vmatprep.mubr.msk.f32.mxu1 %vm1342_vm3, %v1341_v5 }
 0x363   :  { %v1298_v7 = vpop.f32.mrf.mxu1 }
 0x364   :  { %v886_v8 = vadd.f32 %v1298_v7, %v805_v6 }
 0x365   :  { %v880_v10 = vpop.f32.mrf.mxu1 }
 0x366   :  { %v890_v11 = vmax.f32 %v886_v8, 0.0  ;;  %v881_v12 = vadd.f32 %v880_v10, %v800_v9 }
 0x368   :  { %v889_v13 = vmax.f32 %v881_v12, 0.0  ;;  %1300 = vmatpush3.msra.mxu1 %v890_v11 }
 0x369   :  { %1301 = vmatprep.subr.mxu1 %v1341_v5 }
 0x36a   :  { %1302 = vmatpush3.msra.mxu1 %v889_v13 }
 0x36b   :  { %1304 = vmatmul.mubr.msk.f32.vlgmr.msra.gmra.mxu1 %vm340_vm0, %v891_v14 }
 0x42b   :  { %v971_v18 = vpop.f32.mrf.mxu1 }
 0x42c   :  { %v972_v19 = vadd.f32 %v971_v18, %v901_v17 }
 0x42d   :  { %v1305_v20 = vpop.f32.mrf.mxu1 }
 0x42e   :  { %v1086_v21 = vmul.f32 -1.442695, %v972_v19 }
 0x430   :  { %1313 = vpow2.f32 %v1086_v21 }
 0x43d   :  { %v1314_v22 = vpop.eup %1313 }
 0x43e   :  { %v978_v23 = vadd.f32 1.0, %v1314_v22 }
 0x440   :  { %1315 = vrcp.f32 %v978_v23 }
 0x44d   :  { %v1316_v24 = vpop.eup %1315 }
 0x44e   :  { %982 = vst.msk [vmem:[#allocation3] sm:$0x1] %vm981_vm4, %v1316_v24 }
 0x44f   :  { %1328 = shalt.err (!%p1325_p4)
}
 0x450   :  { %992 = dma.vmem_to_hbm [thread:$0]  %s990_s18, 16, %s1705_s13, [#allocation4]  }
 0x451   :  { %1337 = dma.done.wait [#allocation4], 16  }
 0x452   :  { %1338 = vsyncadd [#allocation4], 4294967280 }
 0x453   :  { %996 = vsyncpa [#allocation4], 1 }

</bundles_post_ra>
